<compile_context>
chip_gen: v7x
topology: tpu7x:2x2x1
jax: 0.10.0
libtpu: 0.0.40
codegen_flags: <defaults>
</compile_context>

<pallas_src>
import functools

import jax
import jax.numpy as jnp
from jax.experimental import pallas as pl
from jax.experimental.pallas import tpu as pltpu


# ---------------------------------------------------------------------------
# Tunables (conservative so the same config fits v5e / v6e / v7x)
# ---------------------------------------------------------------------------
_VMEM_LIMIT_BYTES = 32 * 1024 * 1024     # explicit scoped-VMEM ceiling (<= v7x 64 MiB phys)
_STREAM_BUDGET_BYTES = 8 * 1024 * 1024   # byte budget for double-buffered streamed tiles
_NUM_SPLITS = 2                          # leading "parallel" axis (2 TCs on v7x)


def _lane_tile(full_len, rows, n_streams, bytes_per_elem,
               budget_bytes=_STREAM_BUDGET_BYTES):
    """Lane-tile size from a VMEM byte budget: n_streams x 2 buffers x rows x TL."""
    if full_len <= 128:
        return full_len                       # full dim (always a legal block)
    max_tl = budget_bytes // (n_streams * 2 * rows * bytes_per_elem)
    max_tl = max(128, (max_tl // 128) * 128)  # multiple of 128, at least one vreg
    return min(max_tl, (full_len // 128) * 128)


# ---------------------------------------------------------------------------
# Pallas kernels
# ---------------------------------------------------------------------------
def _sum_sq_diff_kernel(a_ref, b_ref, o_ref, *, L, TL, W, nk_p, needs_mask):
    """Partial sum((a-b)^2), streamed over the lane axis, (R, W) lane-dense acc."""
    p = pl.program_id(0)
    j = pl.program_id(1)

    @pl.when(j == 0)
    def _init():
        o_ref[...] = jnp.zeros_like(o_ref)

    d = a_ref[...].astype(jnp.float32) - b_ref[...].astype(jnp.float32)
    if needs_mask:
        g = p * nk_p + j                                   # unclamped global tile index
        lane = jax.lax.broadcasted_iota(jnp.int32, d.shape, 1)
        d = jnp.where(g * TL + lane < L, d, 0.0)
    d2 = d * d

    # Lane-preserving fold of the (R, TL) tile into (R, W): static 128-aligned
    # slices -> pure VALU adds, no cross-lane (XLU) movement per step.
    part = d2[:, 0:W]
    for t in range(1, TL // W):
        part = part + d2[:, t * W:(t + 1) * W]
    o_ref[...] += part[None]                               # resident output accumulator


def _partial_gram_kernel(x_ref, o_ref, *, HW, TK, nk_p, needs_mask, cast_bf16):
    """Partial gram x @ x.T, streamed over the contraction (h*w) axis."""
    p = pl.program_id(0)
    k = pl.program_id(1)

    @pl.when(k == 0)
    def _init():
        o_ref[...] = jnp.zeros_like(o_ref)

    x = x_ref[...]
    if needs_mask:
        g = p * nk_p + k
        lane = jax.lax.broadcasted_iota(jnp.int32, x.shape, 1)
        x = jnp.where(g * TK + lane < HW, x, jnp.zeros_like(x))
    if cast_bf16 and x.dtype == jnp.float32:
        x = x.astype(jnp.bfloat16)                         # full-rate MXU, f32 accumulate

    # x @ x.T without materializing the transpose: contract dim 1 of both operands.
    # TODO(synk): verify via pl.lower_as_mlir that this (1,1)-contraction does not
    # emit a per-step XLU transpose; if it does, feed a pre-transposed (HW, C) view.
    gram = jax.lax.dot_general(
        x, x, (((1,), (1,)), ((), ())), preferred_element_type=jnp.float32)
    o_ref[...] += gram[None]                               # resident f32 gram accumulator


# ---------------------------------------------------------------------------
# Kernel wrappers
# ---------------------------------------------------------------------------
def sum_sq_diff_2d(a, b, *, num_splits=_NUM_SPLITS):
    """sum((a - b)**2) for 2-D arrays of identical shape (rows, lanes)."""
    R, L = a.shape
    bpe = max(a.dtype.itemsize, b.dtype.itemsize)
    TL = _lane_tile(L, R, n_streams=2, bytes_per_elem=bpe)
    W = min(TL, 128)
    nk = pl.cdiv(L, TL)
    P = num_splits
    nk_p = pl.cdiv(nk, P)
    needs_mask = (P * nk_p * TL != L)

    kernel = functools.partial(_sum_sq_diff_kernel, L=L, TL=TL, W=W,
                               nk_p=nk_p, needs_mask=needs_mask)

    def in_map(p, j):
        # Clamp so overshoot iterations (odd splits / ragged tails) stay in bounds;
        # their contribution is zeroed by the in-kernel mask.
        return (0, jnp.minimum(p * nk_p + j, nk - 1))

    parts = pl.pallas_call(
        kernel,
        out_shape=jax.ShapeDtypeStruct((P, R, W), jnp.float32),
        grid_spec=pltpu.PrefetchScalarGridSpec(
            num_scalar_prefetch=0,
            grid=(P, nk_p),
            in_specs=[pl.BlockSpec((R, TL), in_map),
                      pl.BlockSpec((R, TL), in_map)],
            out_specs=pl.BlockSpec((1, R, W), lambda p, j: (p, 0, 0))),
        compiler_params=pltpu.CompilerParams(
            dimension_semantics=("parallel", "arbitrary"),
            vmem_limit_bytes=_VMEM_LIMIT_BYTES),
    )(a, b)
    return jnp.sum(parts)                                  # tiny cross-lane collapse in XLA


def partial_gram(view, *, num_splits=_NUM_SPLITS, cast_bf16=True):
    """Full gram view @ view.T (f32) computed as per-core partials; view is (C, HW)."""
    C, HW = view.shape
    bpe = view.dtype.itemsize
    TK = _lane_tile(HW, C, n_streams=1, bytes_per_elem=bpe)
    nk = pl.cdiv(HW, TK)
    P = num_splits
    nk_p = pl.cdiv(nk, P)
    needs_mask = (P * nk_p * TK != HW)

    kernel = functools.partial(_partial_gram_kernel, HW=HW, TK=TK,
                               nk_p=nk_p, needs_mask=needs_mask, cast_bf16=cast_bf16)

    parts = pl.pallas_call(
        kernel,
        out_shape=jax.ShapeDtypeStruct((P, C, C), jnp.float32),
        grid_spec=pltpu.PrefetchScalarGridSpec(
            num_scalar_prefetch=0,
            grid=(P, nk_p),
            in_specs=[pl.BlockSpec(
                (C, TK), lambda p, k: (0, jnp.minimum(p * nk_p + k, nk - 1)))],
            out_specs=pl.BlockSpec((1, C, C), lambda p, k: (p, 0, 0))),
        compiler_params=pltpu.CompilerParams(
            dimension_semantics=("parallel", "arbitrary"),
            vmem_limit_bytes=_VMEM_LIMIT_BYTES),
    )(view)
    return parts.sum(axis=0)                               # combine per-core partial grams


# ---------------------------------------------------------------------------
# Module wrapper (matches the PyTorch TotalLoss semantics)
# ---------------------------------------------------------------------------
def gram_matrix_ref(x):
    n, c, h, w = x.shape
    view = x.reshape(n * c, h * w)
    return view @ view.T


class TotalLoss:
    def __init__(self, As, P, alpha, beta, verbose=False):
        self.As = [jnp.asarray(A) for A in As]
        # Faithful to the PyTorch code: NxM = A.shape[0] * A.shape[1]
        self.NxMs = [A.shape[0] * A.shape[1] for A in As]
        self.P = jnp.asarray(P)
        self.alpha = alpha
        self.beta = beta
        self.verbose = verbose
        # One jitted function -> content kernel + per-layer gram kernels + scalar
        # glue compile into a single executable; no host sync in the hot path.
        self._loss_fn = jax.jit(self._loss)

    def _loss(self, Gs, F):
        n, c, h, w = F.shape
        content_loss = sum_sq_diff_2d(F.reshape(n * c, h * w),
                                      self.P.reshape(n * c, h * w)) * 0.5

        style_loss = jnp.float32(0.0)
        for A, g, NxM in zip(self.As, Gs, self.NxMs):
            gn, gc, gh, gw = g.shape
            G = partial_gram(g.reshape(gn * gc, gh * gw))
            # Tiny (C, C) epilogue stays in XLA glue (fused with the scalar math).
            term = jnp.sum((A.astype(jnp.float32) - G) ** 2)
            style_loss = style_loss + term / (4.0 * (NxM ** 2))

        total_loss = self.alpha * content_loss + self.beta * style_loss
        return content_loss, style_loss, total_loss

    def __call__(self, Gs, F):
        content_loss, style_loss, total_loss = self._loss_fn(list(Gs), F)
        if self.verbose:
            # Diagnostic print kept to match the PyTorch module (host read only
            # after the jitted computation was dispatched).
            print('content_loss: ', float(content_loss),
                  ' style loss: ', float(style_loss),
                  ' total loss: ', float(total_loss))
        return total_loss


# ---------------------------------------------------------------------------
# Main
# ---------------------------------------------------------------------------
if __name__ == "__main__":
    key = jax.random.PRNGKey(0)
    k_p, k_f, k_g1, k_g2, k_s1, k_s2 = jax.random.split(key, 6)

    # Content feature maps (NCHW)
    P = jax.random.normal(k_p, (1, 4, 16, 16), dtype=jnp.float32)   # target content
    F_feat = jax.random.normal(k_f, (1, 4, 16, 16), dtype=jnp.float32)

    # Generated-image feature maps at two "layers"
    G1 = jax.random.normal(k_g1, (1, 4, 16, 16), dtype=jnp.float32)
    G2 = jax.random.normal(k_g2, (1, 8, 8, 8), dtype=jnp.float32)
    Gs = [G1, G2]

    # Style gram matrices As (deterministic, built from synthetic style features)
    S1 = jax.random.normal(k_s1, (1, 4, 16, 16), dtype=jnp.float32)
    S2 = jax.random.normal(k_s2, (1, 8, 8, 8), dtype=jnp.float32)
    As = [gram_matrix_ref(S1), gram_matrix_ref(S2)]

    alpha, beta = 1.0, 1e-3

    loss_mod = TotalLoss(As, P, alpha, beta, verbose=False)
    total = loss_mod(Gs, F_feat)
    total = jax.block_until_ready(total)

    # --- correctness checks against pure-JAX references ---------------------
    # Content kernel (exact f32 path).
    c_kernel = jax.block_until_ready(
        sum_sq_diff_2d(F_feat.reshape(4, 256), P.reshape(4, 256)))
    c_ref = jnp.sum((F_feat - P) ** 2)
    assert jnp.allclose(c_kernel, c_ref, rtol=1e-5, atol=1e-3), (c_kernel, c_ref)

    # Gram kernel (bf16 MXU inputs, f32 accumulation -> loose tolerance).
    for g in Gs:
        gn, gc, gh, gw = g.shape
        view = g.reshape(gn * gc, gh * gw)
        G_k = jax.block_until_ready(partial_gram(view))
        G_r = jnp.matmul(view, view.T, precision=jax.lax.Precision.HIGHEST)
        assert jnp.allclose(G_k, G_r, rtol=2e-2, atol=5e-1), (G_k, G_r)

    # Full loss (content term dominates; exact in f32).
    content_ref = jnp.sum((F_feat - P) ** 2) / 2.0
    style_ref = jnp.float32(0.0)
    for A, g, NxM in zip(As, Gs, loss_mod.NxMs):
        style_ref = style_ref + jnp.sum((A - gram_matrix_ref(g)) ** 2) / (4.0 * NxM ** 2)
    total_ref = alpha * content_ref + beta * style_ref
    assert jnp.allclose(total, total_ref, rtol=1e-4, atol=1e-4), (total, total_ref)

    print("KERNEL_OK")
</pallas_src>

<mosaic_0001>
module attributes {stable_mosaic.version = 11 : i64} {
  func.func @_partial_gram_kernel(%arg0: i32, %arg1: i32, %arg2: memref<8x64xf32, #tpu.memory_space<vmem>>, %arg3: memref<1x8x8xf32, #tpu.memory_space<vmem>>) attributes {dimension_semantics = [#tpu.dimension_semantics<parallel>, #tpu.dimension_semantics<arbitrary>], iteration_bounds = array<i64: 2, 1>, scalar_prefetch = 0 : i64, scratch_operands = 0 : i64, tpu.core_type = #tpu.core_type<tc>, window_params = [{transform_indices = @transform_0, window_bounds = array<i64: 8, 64>}, {transform_indices = @transform_1, window_bounds = array<i64: 1, 8, 8>}]} {
    %c0_i32 = arith.constant 0 : i32
    %0 = arith.cmpi eq, %arg1, %c0_i32 : i32
    %1 = arith.extui %0 : i1 to i32
    %c0_i32_0 = arith.constant 0 : i32
    %2 = arith.cmpi ne, %1, %c0_i32_0 : i32
    scf.if %2 {
      %cst_10 = arith.constant 0.000000e+00 : f32
      %20 = vector.broadcast %cst_10 : f32 to vector<1x8x8xf32>
      %c0_11 = arith.constant 0 : index
      %c0_12 = arith.constant 0 : index
      %c0_13 = arith.constant 0 : index
      %21 = vector.load %arg3[%c0_11, %c0_12, %c0_13] : memref<1x8x8xf32, #tpu.memory_space<vmem>>, vector<1x8x8xf32>
      tpu.vector_store %arg3[%c0_11, %c0_12, %c0_13], %20 {strides = array<i32>} : memref<1x8x8xf32, #tpu.memory_space<vmem>>, vector<1x8x8xf32>,
    } else {
    }
    %c0 = arith.constant 0 : index
    %c0_1 = arith.constant 0 : index
    %3 = vector.load %arg2[%c0, %c0_1] : memref<8x64xf32, #tpu.memory_space<vmem>>, vector<8x64xf32>
    %c1_i32 = arith.constant 1 : i32
    %4 = arith.muli %arg0, %c1_i32 : i32
    %5 = arith.addi %4, %arg1 : i32
    %6 = tpu.iota {dimensions = array<i32: 1>} : vector<8x64xi32>
    %c64_i32 = arith.constant 64 : i32
    %7 = arith.muli %5, %c64_i32 : i32
    %8 = vector.broadcast %7 : i32 to vector<8x64xi32>
    %9 = arith.addi %8, %6 : vector<8x64xi32>
    %c64_i32_2 = arith.constant 64 : i32
    %10 = vector.broadcast %c64_i32_2 : i32 to vector<8x64xi32>
    %11 = arith.cmpi slt, %9, %10 : vector<8x64xi32>
    %cst = arith.constant 0.000000e+00 : f32
    %12 = vector.broadcast %cst : f32 to vector<8x64xf32>
    %13 = arith.select %11, %3, %12 : vector<8x64xi1>, vector<8x64xf32>
    %14 = arith.truncf %13 : vector<8x64xf32> to vector<8x64xbf16>
    %cst_3 = arith.constant dense<0.000000e+00> : vector<8x8xf32>
    %15 = tpu.matmul %14, %14, %cst_3 {dimension_numbers = #tpu.dot_dimension_numbers<[1], [1], [0], [0], [0, 0, 1, 0], [], []>} : vector<8x64xbf16>, vector<8x64xbf16>, vector<8x8xf32> -> vector<8x8xf32>
    %c0_4 = arith.constant 0 : index
    %c0_5 = arith.constant 0 : index
    %c0_6 = arith.constant 0 : index
    %16 = vector.load %arg3[%c0_4, %c0_5, %c0_6] : memref<1x8x8xf32, #tpu.memory_space<vmem>>, vector<1x8x8xf32>
    %17 = vector.shape_cast %15 : vector<8x8xf32> to vector<1x8x8xf32>
    %18 = arith.addf %16, %17 : vector<1x8x8xf32>
    %c0_7 = arith.constant 0 : index
    %c0_8 = arith.constant 0 : index
    %c0_9 = arith.constant 0 : index
    %19 = vector.load %arg3[%c0_7, %c0_8, %c0_9] : memref<1x8x8xf32, #tpu.memory_space<vmem>>, vector<1x8x8xf32>
    tpu.vector_store %arg3[%c0_7, %c0_8, %c0_9], %18 {strides = array<i32>} : memref<1x8x8xf32, #tpu.memory_space<vmem>>, vector<1x8x8xf32>,
    return
  }
  func.func @transform_0(%arg0: i32, %arg1: i32) -> (i32, i32) {
    %c1_i32 = arith.constant 1 : i32
    %0 = arith.muli %arg0, %c1_i32 : i32
    %1 = arith.addi %0, %arg1 : i32
    %c0_i32 = arith.constant 0 : i32
    %2 = arith.minsi %1, %c0_i32 : i32
    %c0_i32_0 = arith.constant 0 : i32
    %c0_i32_1 = arith.constant 0 : i32
    return %c0_i32_0, %2 : i32, i32
  }
  func.func @transform_1(%arg0: i32, %arg1: i32) -> (i32, i32, i32) {
    %c0_i32 = arith.constant 0 : i32
    %c0_i32_0 = arith.constant 0 : i32
    %c0_i32_1 = arith.constant 0 : i32
    return %arg0, %c0_i32, %c0_i32_0 : i32, i32, i32
  }
}

module attributes {stable_mosaic.version = 11 : i64} {
  func.func @_partial_gram_kernel(%arg0: i32, %arg1: i32, %arg2: memref<4x256xf32, #tpu.memory_space<vmem>>, %arg3: memref<1x4x4xf32, #tpu.memory_space<vmem>>) attributes {dimension_semantics = [#tpu.dimension_semantics<parallel>, #tpu.dimension_semantics<arbitrary>], iteration_bounds = array<i64: 2, 1>, scalar_prefetch = 0 : i64, scratch_operands = 0 : i64, tpu.core_type = #tpu.core_type<tc>, window_params = [{transform_indices = @transform_0, window_bounds = array<i64: 4, 256>}, {transform_indices = @transform_1, window_bounds = array<i64: 1, 4, 4>}]} {
    %c0_i32 = arith.constant 0 : i32
    %0 = arith.cmpi eq, %arg1, %c0_i32 : i32
    %1 = arith.extui %0 : i1 to i32
    %c0_i32_0 = arith.constant 0 : i32
    %2 = arith.cmpi ne, %1, %c0_i32_0 : i32
    scf.if %2 {
      %cst_10 = arith.constant 0.000000e+00 : f32
      %20 = vector.broadcast %cst_10 : f32 to vector<1x4x4xf32>
      %c0_11 = arith.constant 0 : index
      %c0_12 = arith.constant 0 : index
      %c0_13 = arith.constant 0 : index
      %21 = vector.load %arg3[%c0_11, %c0_12, %c0_13] : memref<1x4x4xf32, #tpu.memory_space<vmem>>, vector<1x4x4xf32>
      tpu.vector_store %arg3[%c0_11, %c0_12, %c0_13], %20 {strides = array<i32>} : memref<1x4x4xf32, #tpu.memory_space<vmem>>, vector<1x4x4xf32>,
    } else {
    }
    %c0 = arith.constant 0 : index
    %c0_1 = arith.constant 0 : index
    %3 = vector.load %arg2[%c0, %c0_1] : memref<4x256xf32, #tpu.memory_space<vmem>>, vector<4x256xf32>
    %c1_i32 = arith.constant 1 : i32
    %4 = arith.muli %arg0, %c1_i32 : i32
    %5 = arith.addi %4, %arg1 : i32
    %6 = tpu.iota {dimensions = array<i32: 1>} : vector<4x256xi32>
    %c256_i32 = arith.constant 256 : i32
    %7 = arith.muli %5, %c256_i32 : i32
    %8 = vector.broadcast %7 : i32 to vector<4x256xi32>
    %9 = arith.addi %8, %6 : vector<4x256xi32>
    %c256_i32_2 = arith.constant 256 : i32
    %10 = vector.broadcast %c256_i32_2 : i32 to vector<4x256xi32>
    %11 = arith.cmpi slt, %9, %10 : vector<4x256xi32>
    %cst = arith.constant 0.000000e+00 : f32
    %12 = vector.broadcast %cst : f32 to vector<4x256xf32>
    %13 = arith.select %11, %3, %12 : vector<4x256xi1>, vector<4x256xf32>
    %14 = arith.truncf %13 : vector<4x256xf32> to vector<4x256xbf16>
    %cst_3 = arith.constant dense<0.000000e+00> : vector<4x4xf32>
    %15 = tpu.matmul %14, %14, %cst_3 {dimension_numbers = #tpu.dot_dimension_numbers<[1], [1], [0], [0], [0, 0, 1, 0], [], []>} : vector<4x256xbf16>, vector<4x256xbf16>, vector<4x4xf32> -> vector<4x4xf32>
    %c0_4 = arith.constant 0 : index
    %c0_5 = arith.constant 0 : index
    %c0_6 = arith.constant 0 : index
    %16 = vector.load %arg3[%c0_4, %c0_5, %c0_6] : memref<1x4x4xf32, #tpu.memory_space<vmem>>, vector<1x4x4xf32>
    %17 = vector.shape_cast %15 : vector<4x4xf32> to vector<1x4x4xf32>
    %18 = arith.addf %16, %17 : vector<1x4x4xf32>
    %c0_7 = arith.constant 0 : index
    %c0_8 = arith.constant 0 : index
    %c0_9 = arith.constant 0 : index
    %19 = vector.load %arg3[%c0_7, %c0_8, %c0_9] : memref<1x4x4xf32, #tpu.memory_space<vmem>>, vector<1x4x4xf32>
    tpu.vector_store %arg3[%c0_7, %c0_8, %c0_9], %18 {strides = array<i32>} : memref<1x4x4xf32, #tpu.memory_space<vmem>>, vector<1x4x4xf32>,
    return
  }
  func.func @transform_0(%arg0: i32, %arg1: i32) -> (i32, i32) {
    %c1_i32 = arith.constant 1 : i32
    %0 = arith.muli %arg0, %c1_i32 : i32
    %1 = arith.addi %0, %arg1 : i32
    %c0_i32 = arith.constant 0 : i32
    %2 = arith.minsi %1, %c0_i32 : i32
    %c0_i32_0 = arith.constant 0 : i32
    %c0_i32_1 = arith.constant 0 : i32
    return %c0_i32_0, %2 : i32, i32
  }
  func.func @transform_1(%arg0: i32, %arg1: i32) -> (i32, i32, i32) {
    %c0_i32 = arith.constant 0 : i32
    %c0_i32_0 = arith.constant 0 : i32
    %c0_i32_1 = arith.constant 0 : i32
    return %arg0, %c0_i32, %c0_i32_0 : i32, i32, i32
  }
}

module attributes {stable_mosaic.version = 11 : i64} {
  func.func @_sum_sq_diff_kernel(%arg0: i32, %arg1: i32, %arg2: memref<4x256xf32, #tpu.memory_space<vmem>>, %arg3: memref<4x256xf32, #tpu.memory_space<vmem>>, %arg4: memref<1x4x128xf32, #tpu.memory_space<vmem>>) attributes {dimension_semantics = [#tpu.dimension_semantics<parallel>, #tpu.dimension_semantics<arbitrary>], iteration_bounds = array<i64: 2, 1>, scalar_prefetch = 0 : i64, scratch_operands = 0 : i64, tpu.core_type = #tpu.core_type<tc>, window_params = [{transform_indices = @transform_0, window_bounds = array<i64: 4, 256>}, {transform_indices = @transform_1, window_bounds = array<i64: 4, 256>}, {transform_indices = @transform_2, window_bounds = array<i64: 1, 4, 128>}]} {
    %c0_i32 = arith.constant 0 : i32
    %0 = arith.cmpi eq, %arg1, %c0_i32 : i32
    %1 = arith.extui %0 : i1 to i32
    %c0_i32_0 = arith.constant 0 : i32
    %2 = arith.cmpi ne, %1, %c0_i32_0 : i32
    scf.if %2 {
      %cst_11 = arith.constant 0.000000e+00 : f32
      %24 = vector.broadcast %cst_11 : f32 to vector<1x4x128xf32>
      %c0_12 = arith.constant 0 : index
      %c0_13 = arith.constant 0 : index
      %c0_14 = arith.constant 0 : index
      %25 = vector.load %arg4[%c0_12, %c0_13, %c0_14] : memref<1x4x128xf32, #tpu.memory_space<vmem>>, vector<1x4x128xf32>
      tpu.vector_store %arg4[%c0_12, %c0_13, %c0_14], %24 {strides = array<i32>} : memref<1x4x128xf32, #tpu.memory_space<vmem>>, vector<1x4x128xf32>,
    } else {
    }
    %c0 = arith.constant 0 : index
    %c0_1 = arith.constant 0 : index
    %3 = vector.load %arg2[%c0, %c0_1] : memref<4x256xf32, #tpu.memory_space<vmem>>, vector<4x256xf32>
    %c0_2 = arith.constant 0 : index
    %c0_3 = arith.constant 0 : index
    %4 = vector.load %arg3[%c0_2, %c0_3] : memref<4x256xf32, #tpu.memory_space<vmem>>, vector<4x256xf32>
    %5 = arith.subf %3, %4 : vector<4x256xf32>
    %c1_i32 = arith.constant 1 : i32
    %6 = arith.muli %arg0, %c1_i32 : i32
    %7 = arith.addi %6, %arg1 : i32
    %8 = tpu.iota {dimensions = array<i32: 1>} : vector<4x256xi32>
    %c256_i32 = arith.constant 256 : i32
    %9 = arith.muli %7, %c256_i32 : i32
    %10 = vector.broadcast %9 : i32 to vector<4x256xi32>
    %11 = arith.addi %10, %8 : vector<4x256xi32>
    %c256_i32_4 = arith.constant 256 : i32
    %12 = vector.broadcast %c256_i32_4 : i32 to vector<4x256xi32>
    %13 = arith.cmpi slt, %11, %12 : vector<4x256xi32>
    %cst = arith.constant 0.000000e+00 : f32
    %14 = vector.broadcast %cst : f32 to vector<4x256xf32>
    %15 = arith.select %13, %5, %14 : vector<4x256xi1>, vector<4x256xf32>
    %16 = arith.mulf %15, %15 : vector<4x256xf32>
    %17 = vector.extract_strided_slice %16 {offsets = [0, 0], sizes = [4, 128], strides = [1, 1]} : vector<4x256xf32> to vector<4x128xf32>
    %18 = vector.extract_strided_slice %16 {offsets = [0, 128], sizes = [4, 128], strides = [1, 1]} : vector<4x256xf32> to vector<4x128xf32>
    %19 = arith.addf %17, %18 : vector<4x128xf32>
    %c0_5 = arith.constant 0 : index
    %c0_6 = arith.constant 0 : index
    %c0_7 = arith.constant 0 : index
    %20 = vector.load %arg4[%c0_5, %c0_6, %c0_7] : memref<1x4x128xf32, #tpu.memory_space<vmem>>, vector<1x4x128xf32>
    %21 = vector.shape_cast %19 : vector<4x128xf32> to vector<1x4x128xf32>
    %22 = arith.addf %20, %21 : vector<1x4x128xf32>
    %c0_8 = arith.constant 0 : index
    %c0_9 = arith.constant 0 : index
    %c0_10 = arith.constant 0 : index
    %23 = vector.load %arg4[%c0_8, %c0_9, %c0_10] : memref<1x4x128xf32, #tpu.memory_space<vmem>>, vector<1x4x128xf32>
    tpu.vector_store %arg4[%c0_8, %c0_9, %c0_10], %22 {strides = array<i32>} : memref<1x4x128xf32, #tpu.memory_space<vmem>>, vector<1x4x128xf32>,
    return
  }
  func.func @transform_0(%arg0: i32, %arg1: i32) -> (i32, i32) {
    %c1_i32 = arith.constant 1 : i32
    %0 = arith.muli %arg0, %c1_i32 : i32
    %1 = arith.addi %0, %arg1 : i32
    %c0_i32 = arith.constant 0 : i32
    %2 = arith.minsi %1, %c0_i32 : i32
    %c0_i32_0 = arith.constant 0 : i32
    %c0_i32_1 = arith.constant 0 : i32
    return %c0_i32_0, %2 : i32, i32
  }
  func.func @transform_1(%arg0: i32, %arg1: i32) -> (i32, i32) {
    %c1_i32 = arith.constant 1 : i32
    %0 = arith.muli %arg0, %c1_i32 : i32
    %1 = arith.addi %0, %arg1 : i32
    %c0_i32 = arith.constant 0 : i32
    %2 = arith.minsi %1, %c0_i32 : i32
    %c0_i32_0 = arith.constant 0 : i32
    %c0_i32_1 = arith.constant 0 : i32
    return %c0_i32_0, %2 : i32, i32
  }
  func.func @transform_2(%arg0: i32, %arg1: i32) -> (i32, i32, i32) {
    %c0_i32 = arith.constant 0 : i32
    %c0_i32_0 = arith.constant 0 : i32
    %c0_i32_1 = arith.constant 0 : i32
    return %arg0, %c0_i32, %c0_i32_0 : i32, i32, i32
  }
}

</mosaic_0001>

<bundles_post_ra>
// kernel: _loss.5
= control target key start
LH: loop header
LB: loop body
LE: loop exit
PB: predicated region body
PF: predicated region fallthrough
CT: control target
= control target key end

     0   :  { %s355_s6 = smov 0   ;;  %s357_s7 = smov 0   ;;  %s390_s0 = inlined_call_operand.vmem [shape: f32[8,64], index: 0, kind: input, shape index: {}]   ;;  %s391_s1 = inlined_call_operand.vmem [shape: f32[2,8,8], index: 1, kind: output, shape index: {}]  }
   0x1   :  { %s359_s8 = smov 0  }
   0x2 LB: > { %s23_s9 = sadd.s32 1, %s337_s7  ;;  %p275_p0 = scmp.ge.s32.totalorder %s341_s8, 1  ;;  %s341_s8 = sphi %s359_s8, %s11_s8   ;;  %s337_s7 = sphi %s357_s7, %s393_s7   ;;  %s333_s6 = sphi %s355_s6, %s392_s6  }
   0x3   : > { %p25_p1 = scmp.ge.s32.totalorder %s23_s9, 2  ;;  %p110_p2 = scmp.lt.s32.totalorder %s341_s8, 3 }
   0x5   : > { %s395_s9 = smov (%p25_p1, %s23_s9), 0  ;;  %p111_p3 = pnand %p275_p0, %p110_p2 }
   0x6   : > { %p132_p4 = scmp.lt.s32.totalorder (!%p111_p3), %s333_s6, 0  ;;  %v154_v0 = vlaneseq (!%p111_p3)  ;;  %s281_s10 = sshll.u32 (!%p111_p3), %s333_s6, 6  ;;  %v343_v1 = vmov (!%p111_p3), 0.0   ;;  %vm344_vm0 = vmmov (!%p111_p3), 0   ;;  %vm150_vm1 = vcmask (!%p111_p3), 64512  }
   0x7   : > { %114 = sbr.rel (%p111_p3) target bundleno = 246 (0xf6), region = 24  ;;  %287 = vmatprep.subr.bf16.mxu0 (!%p111_p3), %v343_v1  ;;  %v157_v2 = vstv (!%p111_p3), %s281_s10  ;;  %289 = vmatprep.mubr.msk.bf16.mxu0 (!%p111_p3), %vm344_vm0, %v343_v1  ;;  %p141_p5 = scmp.lt.s32.totalorder (!%p111_p3), %s333_s6, 1  ;;  %vm162_vm3 = vcmask (!%p111_p3), 523264  }
   0x8   : > { %v155_v3 = vand.u32 (!%p111_p3), 127, %v154_v0 }
   0xa   : > { %v158_v4 = vadd.s32 (!%p111_p3), %v157_v2, %v155_v3 }
   0xc   : > { %vm159_vm2 = vcmp.lt.s32.totalorder (!%p111_p3), %v158_v4, 64 }
   0xe   : > { %s133_s11 = scalar_select %p132_p4, %s333_s6, 0 }
   0xf   : > { %s397_s6 = smov (!%p141_p5, %s333_s6), 1 }
  0x10   : > { %s399_s11 = smov (!%p132_p4, %s133_s11), 0  ;;  %s280_s12 = sshll.u32 %s397_s6, 3 }
  0x11   : > { %s279_s13 = sshll.u32 %s399_s11, 3  ;;  %s144_s16 = scalar_lea.vmem %s391_s1, %s280_s12 }
  0x12   : > { %s137_s19 = scalar_lea.vmem %s390_s0, %s279_s13  ;;  %151 = vst.msk [vmem:[%s144_s16] sm:$0xff] %vm150_vm1, %v343_v1 }
  0x13   : > { %v152_v5 = vld [vmem:[%s137_s19] sm:$0xff] }
  0x14   : > { %v160_v6 = vsel %vm159_vm2, %v152_v5, 0.0 }
  0x15   : > { %v161_v7 = vpack.c.bf16 %v160_v6, %v160_v6 }
  0x17   : > { %v164_v8 = vsel %vm162_vm3, %v161_v7, 0 }
  0x18   : > { %288 = vmatpush3.bf16.xpose.msra.mxu0 %v164_v8 }
  0x19   : > { %v206_v9 = vld [vmem:[%s144_s16] sm:$0xff] }
  0x1f   : > { %290 = vmatmul.mubr.msk.bf16.vlgmr.msra.gmra.mrb[0].mxu0 %vm162_vm3, %v161_v7 }
  0xf2   : > { %v200_v10 = vpop.f32.mrb[0].mxu0 }
  0xf3   : > { %v207_v11 = vadd.f32 %v206_v9, %v200_v10  ;;  %v291_v12 = vpop.f32.mrb[1].mxu0 }
  0xf4   : > { %v203_v13 = vpop.f32.mrb[2].mxu0 }
  0xf5   : > { %209 = vst.msk [vmem:[%s144_s16] sm:$0xff] %vm150_vm1, %v207_v11  ;;  %v292_v14 = vpop.f32.mrb[3].mxu0 }
  0xf6 PF: > { %s11_s8 = sadd.s32 1, %s341_s8   ;;  %s392_s6 = smov %s337_s7 }
  0xf7   : > { %p8_p6 = scmp.ge.s32.totalorder %s11_s8, 4   ;;  %s393_s7 = smov %s395_s9 }
  0xf9   :  { %10 = sbr.rel (!%p8_p6) target bundleno = 2 (0x2), region = 58 }

// kernel: _loss.4
= control target key start
LH: loop header
LB: loop body
LE: loop exit
PB: predicated region body
PF: predicated region fallthrough
CT: control target
= control target key end

     0   :  { %s364_s6 = smov 0   ;;  %s366_s7 = smov 0   ;;  %s399_s0 = inlined_call_operand.vmem [shape: f32[4,256], index: 0, kind: input, shape index: {}]   ;;  %s400_s1 = inlined_call_operand.vmem [shape: f32[2,4,4], index: 1, kind: output, shape index: {}]  }
   0x1   :  { %s368_s8 = smov 0  }
   0x2 LB: > { %s23_s9 = sadd.s32 1, %s347_s7  ;;  %p284_p0 = scmp.ge.s32.totalorder %s351_s8, 1  ;;  %s351_s8 = sphi %s368_s8, %s11_s8   ;;  %s347_s7 = sphi %s366_s7, %s402_s7   ;;  %s343_s6 = sphi %s364_s6, %s401_s6  }
   0x3   : > { %p25_p1 = scmp.ge.s32.totalorder %s23_s9, 2  ;;  %p112_p2 = scmp.lt.s32.totalorder %s351_s8, 3 }
   0x5   : > { %s404_s9 = smov (%p25_p1, %s23_s9), 0  ;;  %p113_p3 = pnand %p284_p0, %p112_p2 }
   0x6   : > { %p135_p4 = scmp.lt.s32.totalorder (!%p113_p3), %s343_s6, 0  ;;  %v159_v0 = vlaneseq (!%p113_p3)  ;;  %s288_s10 = sshll.u32 (!%p113_p3), %s343_s6, 8  ;;  %vm155_vm0 = vcmask (!%p113_p3), 27648   ;;  %v353_v6 = vmov (!%p113_p3), 0.0  }
   0x7   : > { %116 = sbr.rel (%p113_p3) target bundleno = 250 (0xfa), region = 24  ;;  %p146_p5 = scmp.lt.s32.totalorder (!%p113_p3), %s343_s6, 1  ;;  %v163_v2 = vstv (!%p113_p3), %s288_s10 }
   0x8   : > { %v160_v1 = vand.u32 (!%p113_p3), 127, %v159_v0 }
   0xa   : > { %v161_v3 = vadd.s32 (!%p113_p3), 128, %v160_v1  ;;  %v164_v5 = vadd.s32 (!%p113_p3), %v163_v2, %v160_v1 }
   0xc   : > { %v165_v4 = vadd.s32 (!%p113_p3), %v163_v2, %v161_v3  ;;  %vm166_vm2 = vcmp.lt.s32.totalorder (!%p113_p3), %v164_v5, 256 }
   0xd   : > { %vm292_vm4 = vmpackc.low (!%p113_p3), %vm166_vm2, %vm166_vm2 }
   0xe   : > { %s136_s11 = scalar_select %p135_p4, %s343_s6, 0  ;;  %vm167_vm1 = vcmp.lt.s32.totalorder %v165_v4, 256 }
   0xf   : > { %s406_s6 = smov (!%p146_p5, %s343_s6), 1  ;;  %vm289_vm3 = vmpackc.low %vm167_vm1, %vm167_vm1 }
  0x10   : > { %s285_s12 = sshll.u32 %s136_s11, 1  ;;  %s287_s13 = sshll.u32 %s406_s6, 2 }
  0x11   : > { %p138_p6 = scmp.lt.s32.totalorder %s285_s12, 1  ;;  %s149_s16 = scalar_lea.vmem %s400_s1, %s287_s13 }
  0x12   : > { %156 = vst.msk [vmem:[%s149_s16] sm:$0xf] %vm155_vm0, %v353_v6 }
  0x13   : > { %s408_s12 = smov (!%p138_p6, %s285_s12), 1 }
  0x14   : > { %s286_s17 = sshll.u32 %s408_s12, 2 }
  0x15   : > { %s141_s20 = scalar_lea.vmem %s399_s0, %s286_s17 }
  0x16   : > { %v157_v7 = vld [vmem:[%s141_s20] sm:$0xff] }
  0x17   : > { %v169_v8 = vcombine.high %v157_v7, %v157_v7  ;;  %v293_v9 = vpack.c.bf16 %v157_v7, %v157_v7 }
  0x19   : > { %v290_v10 = vpack.c.bf16 %v169_v8, %v169_v8  ;;  %v215_v11 = vld [vmem:[%s149_s16] sm:$0xf] }
  0x1b   : > { %291 = vmatprep.subr.msk.bf16.mxu0 %vm289_vm3, %v290_v10  ;;  %297 = vmatprep.mubr.msk.bf16.mxu0 %vm289_vm3, %v290_v10 }
  0x1c   : > { %294 = vmatpush1.bf16.xpose.msk.msra.mxu0 %vm292_vm4, %v293_v9 }
  0x23   : > { %300 = vmatmul.mubr.msk.bf16.vlgmr.msra.gmra.mrb[0].mxu0 %vm292_vm4, %v293_v9 }
  0xf6   : > { %v209_v12 = vpop.f32.mrb[0].mxu0 }
  0xf7   : > { %v216_v13 = vadd.f32 %v215_v11, %v209_v12  ;;  %v211_v14 = vpop.f32.mrb[1].mxu0 }
  0xf8   : > { %v212_v15 = vpop.f32.mrb[2].mxu0 }
  0xf9   : > { %218 = vst.msk [vmem:[%s149_s16] sm:$0xf] %vm155_vm0, %v216_v13  ;;  %v213_v16 = vpop.f32.mrb[3].mxu0 }
  0xfa PF: > { %s11_s8 = sadd.s32 1, %s351_s8   ;;  %s401_s6 = smov %s347_s7 }
  0xfb   : > { %p8_p7 = scmp.ge.s32.totalorder %s11_s8, 4   ;;  %s402_s7 = smov %s404_s9 }
  0xfd   :  { %10 = sbr.rel (!%p8_p7) target bundleno = 2 (0x2), region = 58 }

// kernel: _loss.3
= control target key start
LH: loop header
LB: loop body
LE: loop exit
PB: predicated region body
PF: predicated region fallthrough
CT: control target
= control target key end

     0   :  { %s400_s9 = smov 0   ;;  %s402_s10 = smov 0   ;;  %s436_s0 = inlined_call_operand.vmem [shape: f32[4,256], index: 0, kind: input, shape index: {}]   ;;  %s437_s1 = inlined_call_operand.vmem [shape: f32[4,256], index: 1, kind: input, shape index: {}]   ;;  %s438_s2 = inlined_call_operand.vmem [shape: f32[2,4,128], index: 2, kind: output, shape index: {}]  }
   0x1   :  { %s404_s11 = smov 0  }
   0x2 LB: > { %s24_s12 = sadd.s32 1, %s378_s10  ;;  %p326_p0 = scmp.ge.s32.totalorder %s382_s11, 1  ;;  %s382_s11 = sphi %s404_s11, %s12_s11   ;;  %s378_s10 = sphi %s402_s10, %s440_s10   ;;  %s374_s9 = sphi %s400_s9, %s439_s9  }
   0x3   : > { %p26_p1 = scmp.ge.s32.totalorder %s24_s12, 2  ;;  %p160_p2 = scmp.lt.s32.totalorder %s382_s11, 3 }
   0x5   : > { %s442_s12 = smov (%p26_p1, %s24_s12), 0  ;;  %p161_p3 = pnand %p326_p0, %p160_p2 }
   0x6   : > { %p216_p4 = scmp.lt.s32.totalorder (!%p161_p3), %s374_s9, 1  ;;  %p193_p5 = scmp.lt.s32.totalorder (!%p161_p3), %s374_s9, 0  ;;  %v229_v0 = vlaneseq (!%p161_p3)  ;;  %v384_v3 = vmov (!%p161_p3), 0.0  }
   0x7   : > { %164 = sbr.rel (%p161_p3) target bundleno = 36 (0x24), region = 28  ;;  %s332_s13 = sshll.u32 (!%p161_p3), %s374_s9, 8 }
   0x8   : > { %v230_v1 = vand.u32 (!%p161_p3), 127, %v229_v0  ;;  %v233_v2 = vstv (!%p161_p3), %s332_s13 }
   0xa   : > { %v231_v4 = vadd.s32 (!%p161_p3), 128, %v230_v1  ;;  %v234_v5 = vadd.s32 (!%p161_p3), %v233_v2, %v230_v1 }
   0xc   : > { %v235_v6 = vadd.s32 (!%p161_p3), %v233_v2, %v231_v4  ;;  %vm236_vm0 = vcmp.lt.s32.totalorder (!%p161_p3), %v234_v5, 256 }
   0xe   : > { %s217_s14 = scalar_select %p216_p4, %s374_s9, 1  ;;  %vm237_vm1 = vcmp.lt.s32.totalorder %v235_v6, 256 }
   0xf   : > { %s444_s9 = smov (!%p193_p5, %s374_s9), 0 }
  0x10   : > { %s331_s15 = sshll.u32 %s217_s14, 2  ;;  %s327_s19 = sshll.u32 %s444_s9, 1 }
  0x11   : > { %s219_s18 = scalar_lea.vmem %s438_s2, %s331_s15  ;;  %p196_p6 = scmp.lt.s32.totalorder %s327_s19, 1 }
  0x12   : > { %224 = vst [vmem:[%s219_s18] sm:$0xf] %v384_v3 }
  0x13   : > { %s446_s19 = smov (!%p196_p6, %s327_s19), 1 }
  0x14   : > { %s328_s20 = sshll.u32 %s446_s19, 2 }
  0x15   : > { %s199_s23 = scalar_lea.vmem %s436_s0, %s328_s20  ;;  %s211_s26 = scalar_lea.vmem %s437_s1, %s328_s20 }
  0x16   : > { %v225_v7 = vld [vmem:[%s199_s23] sm:$0xff] }
  0x17   : > { %v226_v8 = vld [vmem:[%s211_s26] sm:$0xff] }
  0x18   : > { %v227_v9 = vsub.f32 %v225_v7, %v226_v8 }
  0x19   : > { %v246_v15 = vld [vmem:[%s219_s18] sm:$0xf] }
  0x1a   : > { %v239_v10 = vcombine.high %v227_v9, %v227_v9  ;;  %v241_v11 = vsel %vm236_vm0, %v227_v9, 0.0 }
  0x1b   : > { %v243_v12 = vmul.f32 %v241_v11, %v241_v11 }
  0x1c   : > { %v242_v13 = vsel %vm237_vm1, %v239_v10, 0.0 }
  0x1d   : > { %v244_v14 = vmul.f32 %v242_v13, %v242_v13 }
  0x1f   : > { %v245_v16 = vadd.f32 %v244_v14, %v243_v12 }
  0x21   : > { %v247_v17 = vadd.f32 %v246_v15, %v245_v16 }
  0x23   : > { %248 = vst [vmem:[%s219_s18] sm:$0xf] %v247_v17 }
  0x24 PF: > { %s12_s11 = sadd.s32 1, %s382_s11   ;;  %s439_s9 = smov %s378_s10 }
  0x25   : > { %p9_p7 = scmp.ge.s32.totalorder %s12_s11, 4   ;;  %s440_s10 = smov %s442_s12 }
  0x27   :  { %11 = sbr.rel (!%p9_p7) target bundleno = 2 (0x2), region = 65 }

</bundles_post_ra>
